<compile_context>
chip_gen: v5e
topology: v5e:2x2
jax: 0.10.0
libtpu: 0.0.40
codegen_flags: <defaults>
</compile_context>

<pallas_src>
import numpy as np
import jax
import jax.numpy as jnp
from jax.experimental import pallas as pl
from jax.experimental.pallas import tpu as pltpu


def _cin_kernel(xl_ref, x0_ref, w_ref, o_ref):
    """One grid step processes a lane-dense slab of TB batch elements.

    xl_ref: (H, L)      with L = TB * D (batch folded into the lane axis)
    x0_ref: (M, L)
    w_ref : (K, H, M)   full weight, resident across the grid (constant index map)
    o_ref : (K, L)
    """
    xl = xl_ref[...].astype(jnp.float32)     # (H, L)
    x0 = x0_ref[...].astype(jnp.float32)     # (M, L)
    w = w_ref[...].astype(jnp.float32)       # (K, H, M)  load + cast once, hoisted
    K = w_ref.shape[0]

    rows = []
    # K (= H_next) is small for this module (default 3): a static unroll keeps
    # everything 2-D (no in-kernel reshapes / relayouts).  For large production
    # K, chunk this loop (tile K) to bound vreg pressure.
    for k in range(K):
        t_k = jnp.dot(w[k], x0, preferred_element_type=jnp.float32)   # (H, L)  MXU
        rows.append(jnp.sum(t_k * xl, axis=0, keepdims=True))         # (1, L)  VPU + XLU
    # Single fused, lane-dense store per grid step.
    o_ref[...] = jnp.concatenate(rows, axis=0).astype(o_ref.dtype)


def _pick_batch_tile(B, D, n_rows, elem_bytes=4, vmem_budget_bytes=8 * 1024 * 1024):
    """Largest TB dividing B with TB*D a multiple of 128 and double-buffered
    blocks comfortably under the scoped VMEM limit (conservative for v7x)."""
    max_lanes = max(128, vmem_budget_bytes // (2 * n_rows * max(elem_bytes, 1)))
    best = None
    for tb in range(1, B + 1):
        if B % tb:
            continue
        lanes = tb * D
        if lanes > max_lanes:
            break
        if lanes % 128 == 0:
            best = tb
    if best is None:
        best = B  # full lane extent is always a legal block shape
    return best


def cin_layer(x_l, x_0, weight, *, interpret=False):
    """
    x_l:    (B, H, D)
    x_0:    (B, M, D)
    weight: (H_next, H*M)   (row k = weights of the k-th nn.Linear(H*M, 1, bias=False))
    returns (B, H_next, D)
    """
    B, H, D = x_l.shape
    _, M, _ = x_0.shape
    K = weight.shape[0]
    assert weight.shape[1] == H * M

    # Wrapper-side layout plumbing: fold batch into the lane (last) axis and do
    # the torch-order weight reshape here so the kernel never reshapes anything.
    xl2 = jnp.transpose(x_l, (1, 0, 2)).reshape(H, B * D)    # xl2[h, b*D+d] = x_l[b,h,d]
    x02 = jnp.transpose(x_0, (1, 0, 2)).reshape(M, B * D)    # x02[m, b*D+d] = x_0[b,m,d]
    w3 = weight.reshape(K, H, M)                             # w3[k,h,m] = weight[k, h*M+m]

    elem_bytes = jnp.dtype(x_l.dtype).itemsize
    TB = _pick_batch_tile(B, D, n_rows=H + M + K, elem_bytes=elem_bytes)
    L = TB * D
    grid = (B // TB,)

    cost = pl.CostEstimate(
        flops=2 * B * D * K * H * M + 2 * B * D * K * H,
        transcendentals=0,
        bytes_accessed=(H + M + K) * B * D * elem_bytes + K * H * M * elem_bytes,
    )

    out2 = pl.pallas_call(
        _cin_kernel,
        out_shape=jax.ShapeDtypeStruct((K, B * D), x_l.dtype),
        grid_spec=pltpu.PrefetchScalarGridSpec(
            num_scalar_prefetch=0,
            grid=grid,
            in_specs=[
                pl.BlockSpec((H, L), lambda b: (0, b)),
                pl.BlockSpec((M, L), lambda b: (0, b)),
                pl.BlockSpec((K, H, M), lambda b: (0, 0, 0)),
            ],
            out_specs=pl.BlockSpec((K, L), lambda b: (0, b)),
        ),
        compiler_params=pltpu.CompilerParams(
            dimension_semantics=("parallel",)),
        cost_estimate=cost,
        interpret=interpret,
    )(xl2, x02, w3)

    # (K, B*D) -> (B, K, D)
    return jnp.transpose(out2.reshape(K, B, D), (1, 0, 2))


def cin_layer_reference(x_l, x_0, weight):
    """Pure-JAX reference mirroring the PyTorch forward exactly."""
    B, H, D = x_l.shape
    _, M, _ = x_0.shape
    xl_p = jnp.transpose(x_l, (0, 2, 1))[..., :, None]     # (B, D, H, 1)
    x0_p = jnp.transpose(x_0, (0, 2, 1))[..., None, :]     # (B, D, 1, M)
    xll = jnp.matmul(xl_p, x0_p).reshape(B, D, H * M)      # (B, D, H*M)
    out = jnp.einsum('bdn,kn->bdk', xll, weight,
                     precision=jax.lax.Precision.HIGHEST)  # (B, D, K)
    return jnp.transpose(out, (0, 2, 1))                   # (B, K, D)


def _run_case(B, H, M, D, H_next, seed):
    key = jax.random.PRNGKey(seed)
    k1, k2, k3 = jax.random.split(key, 3)
    x_l = jax.random.normal(k1, (B, H, D), dtype=jnp.float32)
    x_0 = jax.random.normal(k2, (B, M, D), dtype=jnp.float32)
    bound = 1.0 / np.sqrt(H * M)
    weight = jax.random.uniform(k3, (H_next, H * M), dtype=jnp.float32,
                                minval=-bound, maxval=bound)

    out = jax.block_until_ready(cin_layer(x_l, x_0, weight))
    ref = cin_layer_reference(x_l, x_0, weight)
    assert out.shape == (B, H_next, D)
    np.testing.assert_allclose(np.asarray(out), np.asarray(ref), rtol=1e-5, atol=1e-5)


if __name__ == "__main__":
    # Small shapes consistent with the module's forward (single grid step,
    # full-extent lane block < 128).
    _run_case(B=2, H=4, M=5, D=16, H_next=3, seed=0)
    # Larger batch to exercise the lane-dense (multiple-of-128) tiled path.
    _run_case(B=16, H=4, M=5, D=16, H_next=3, seed=1)
    print("KERNEL_OK")
</pallas_src>

<mosaic_0001>
module attributes {stable_mosaic.version = 11 : i64} {
  func.func @_cin_kernel(%arg0: i32, %arg1: memref<4x32xf32, #tpu.memory_space<vmem>>, %arg2: memref<5x32xf32, #tpu.memory_space<vmem>>, %arg3: memref<3x4x5xf32, #tpu.memory_space<vmem>>, %arg4: memref<3x32xf32, #tpu.memory_space<vmem>>) attributes {dimension_semantics = [#tpu.dimension_semantics<parallel>], iteration_bounds = array<i64: 1>, scalar_prefetch = 0 : i64, scratch_operands = 0 : i64, tpu.core_type = #tpu.core_type<tc>, window_params = [{transform_indices = @transform_0, window_bounds = array<i64: 4, 32>}, {transform_indices = @transform_1, window_bounds = array<i64: 5, 32>}, {pipeline_mode = #tpu.pipeline_mode<synchronous>, transform_indices = @transform_2, window_bounds = array<i64: 3, 4, 5>}, {transform_indices = @transform_3, window_bounds = array<i64: 3, 32>}]} {
    %c0 = arith.constant 0 : index
    %c0_0 = arith.constant 0 : index
    %0 = vector.load %arg1[%c0, %c0_0] : memref<4x32xf32, #tpu.memory_space<vmem>>, vector<4x32xf32>
    %c0_1 = arith.constant 0 : index
    %c0_2 = arith.constant 0 : index
    %1 = vector.load %arg2[%c0_1, %c0_2] : memref<5x32xf32, #tpu.memory_space<vmem>>, vector<5x32xf32>
    %c0_3 = arith.constant 0 : index
    %c0_4 = arith.constant 0 : index
    %c0_5 = arith.constant 0 : index
    %2 = vector.load %arg3[%c0_3, %c0_4, %c0_5] : memref<3x4x5xf32, #tpu.memory_space<vmem>>, vector<3x4x5xf32>
    %3 = vector.extract_strided_slice %2 {offsets = [0, 0, 0], sizes = [1, 4, 5], strides = [1, 1, 1]} : vector<3x4x5xf32> to vector<1x4x5xf32>
    %4 = vector.shape_cast %3 : vector<1x4x5xf32> to vector<4x5xf32>
    %cst = arith.constant dense<0.000000e+00> : vector<4x32xf32>
    %5 = tpu.matmul %4, %1, %cst {dimension_numbers = #tpu.dot_dimension_numbers<[1], [0], [0], [1], [0, 0, 1, 1], [], []>} : vector<4x5xf32>, vector<5x32xf32>, vector<4x32xf32> -> vector<4x32xf32>
    %6 = arith.mulf %5, %0 : vector<4x32xf32>
    %cst_6 = arith.constant dense<0.000000e+00> : vector<32xf32>
    %7 = vector.multi_reduction <add>, %6, %cst_6 [0] : vector<4x32xf32> to vector<32xf32>
    %8 = vector.shape_cast %7 : vector<32xf32> to vector<1x32xf32>
    %9 = vector.extract_strided_slice %2 {offsets = [1, 0, 0], sizes = [1, 4, 5], strides = [1, 1, 1]} : vector<3x4x5xf32> to vector<1x4x5xf32>
    %10 = vector.shape_cast %9 : vector<1x4x5xf32> to vector<4x5xf32>
    %cst_7 = arith.constant dense<0.000000e+00> : vector<4x32xf32>
    %11 = tpu.matmul %10, %1, %cst_7 {dimension_numbers = #tpu.dot_dimension_numbers<[1], [0], [0], [1], [0, 0, 1, 1], [], []>} : vector<4x5xf32>, vector<5x32xf32>, vector<4x32xf32> -> vector<4x32xf32>
    %12 = arith.mulf %11, %0 : vector<4x32xf32>
    %cst_8 = arith.constant dense<0.000000e+00> : vector<32xf32>
    %13 = vector.multi_reduction <add>, %12, %cst_8 [0] : vector<4x32xf32> to vector<32xf32>
    %14 = vector.shape_cast %13 : vector<32xf32> to vector<1x32xf32>
    %15 = vector.extract_strided_slice %2 {offsets = [2, 0, 0], sizes = [1, 4, 5], strides = [1, 1, 1]} : vector<3x4x5xf32> to vector<1x4x5xf32>
    %16 = vector.shape_cast %15 : vector<1x4x5xf32> to vector<4x5xf32>
    %cst_9 = arith.constant dense<0.000000e+00> : vector<4x32xf32>
    %17 = tpu.matmul %16, %1, %cst_9 {dimension_numbers = #tpu.dot_dimension_numbers<[1], [0], [0], [1], [0, 0, 1, 1], [], []>} : vector<4x5xf32>, vector<5x32xf32>, vector<4x32xf32> -> vector<4x32xf32>
    %18 = arith.mulf %17, %0 : vector<4x32xf32>
    %cst_10 = arith.constant dense<0.000000e+00> : vector<32xf32>
    %19 = vector.multi_reduction <add>, %18, %cst_10 [0] : vector<4x32xf32> to vector<32xf32>
    %20 = vector.shape_cast %19 : vector<32xf32> to vector<1x32xf32>
    %21 = tpu.concatenate %8, %14, %20 in 0 : vector<1x32xf32>, vector<1x32xf32>, vector<1x32xf32> -> vector<3x32xf32>
    %c0_11 = arith.constant 0 : index
    %c0_12 = arith.constant 0 : index
    %22 = vector.load %arg4[%c0_11, %c0_12] : memref<3x32xf32, #tpu.memory_space<vmem>>, vector<3x32xf32>
    tpu.vector_store %arg4[%c0_11, %c0_12], %21 {strides = array<i32>} : memref<3x32xf32, #tpu.memory_space<vmem>>, vector<3x32xf32>,
    return
  }
  func.func @transform_0(%arg0: i32) -> (i32, i32) {
    %c0_i32 = arith.constant 0 : i32
    %c0_i32_0 = arith.constant 0 : i32
    return %c0_i32, %arg0 : i32, i32
  }
  func.func @transform_1(%arg0: i32) -> (i32, i32) {
    %c0_i32 = arith.constant 0 : i32
    %c0_i32_0 = arith.constant 0 : i32
    return %c0_i32, %arg0 : i32, i32
  }
  func.func @transform_2(%arg0: i32) -> (i32, i32, i32) {
    %c0_i32 = arith.constant 0 : i32
    %c0_i32_0 = arith.constant 0 : i32
    %c0_i32_1 = arith.constant 0 : i32
    %c0_i32_2 = arith.constant 0 : i32
    return %c0_i32, %c0_i32_0, %c0_i32_1 : i32, i32, i32
  }
  func.func @transform_3(%arg0: i32) -> (i32, i32) {
    %c0_i32 = arith.constant 0 : i32
    %c0_i32_0 = arith.constant 0 : i32
    return %c0_i32, %arg0 : i32, i32
  }
}

</mosaic_0001>

<bundles_post_ra>
// kernel: tpu_custom_call.1
= control target key start
LH: loop header
LB: loop body
LE: loop exit
PB: predicated region body
PF: predicated region fallthrough
CT: control target
= control target key end

     0   :  { %8 = vsyncpa [#allocation3], 0  ;;  %s338_s0 = inlined_call_operand.hbm [shape: f32[4,32], index: 0, kind: input, shape index: {}]   ;;  %s339_s1 = inlined_call_operand.hbm [shape: f32[5,32], index: 1, kind: input, shape index: {}]   ;;  %s340_s2 = inlined_call_operand.hbm [shape: f32[3,4,5], index: 2, kind: input, shape index: {}]   ;;  %s341_s3 = inlined_call_operand.hbm [shape: f32[3,32], index: 3, kind: output, shape index: {}]  }
   0x1   :  { %9 = vsyncpa [#allocation6], 0  ;;  %s27_s14 = sshll.u32 %s339_s1, 4  ;;  %s28_s14 = int_to_ptr.hbm [resolvable:$true] %s27_s14 }
   0x2   :  { %10 = vsyncpa [#allocation4], 0  ;;  %s300_s15 = smov [#allocation5]   ;;  %s16_s19 = sshll.u32 %s338_s0, 4  ;;  %s17_s19 = int_to_ptr.hbm [resolvable:$true] %s16_s19 }
   0x3   :  { %s29_s16 = sshll.u32 %s300_s15, 4  ;;  %s301_s20 = smov [#allocation2]   ;;  %s30_s16 = int_to_ptr.vmem [resolvable:$true] %s29_s16 }
   0x4   :  { %32 = dma.hbm_to_vmem [thread:$0]  %s28_s14, 128, %s30_s16, [#allocation6]  }
   0x5   :  { %s18_s21 = sshll.u32 %s301_s20, 4  ;;  %s37_s24 = sshll.u32 %s340_s2, 4  ;;  %s19_s21 = int_to_ptr.vmem [resolvable:$true] %s18_s21  ;;  %s38_s24 = int_to_ptr.hbm [resolvable:$true] %s37_s24 }
   0x6   :  { %21 = dma.hbm_to_vmem [thread:$0]  %s17_s19, 64, %s19_s21, [#allocation3]  }
   0x7   :  { %s302_s1 = smov [#allocation7]   ;;  %s303_s26 = smov 64  }
   0x8   :  { %s39_s25 = sshll.u32 %s302_s1, 4  ;;  %s304_s27 = smov 4   ;;  %s40_s25 = int_to_ptr.vmem [resolvable:$true] %s39_s25 }
   0x9   :  { %45 = dma.hbm_to_vmem [thread:$0]  %s38_s24, 192, %s40_s25, [#allocation6], %s303_s26, %s303_s26, %s304_s27  }
   0xa   :  { %294 = dma.done.wait [#allocation3], 64  }
   0xb   :  { %295 = vsyncadd [#allocation3], 4294967232 }
   0xc   :  { %296 = dma.done.wait [#allocation6], 320  }
   0xd   :  { %297 = vsyncadd [#allocation6], 4294966976  ;;  %vm67_vm0 = vcmask 1044480   ;;  %vm63_vm1 = vcmask 39936   ;;  %v59_v0 = vld [vmem:[#allocation5] sm:$0x1f] }
   0xe   :  { %v60_v1 = vld [vmem:[#allocation7] sm:$0xf]  ;;  %v61_v2 = vld [vmem:[#allocation7 + $0x4] sm:$0xf]  ;;  %186 = vmatpush.msk.msra.mxu0 %vm67_vm0, %v59_v0  ;;  %188 = vmatpush.msk.msra.mxu1 %vm67_vm0, %v59_v0  ;;  %v62_v3 = vld [vmem:[#allocation7 + $0x8] sm:$0xf] }
   0xf   :  { %190 = vmatpush.msk.msra.mxu2 %vm67_vm0, %v59_v0  ;;  %187 = vmatmul.msk.f32.vlgmr.msra.gmra.mxu0 %vm63_vm1, %v60_v1  ;;  %v58_v4 = vld [vmem:[#allocation2] sm:$0xf]  ;;  %vm92_vm2 = vcmask 257024   ;;  %vm162_vm3 = vcmask 1040384   ;;  %s305_s0 = smov [#allocation8]   ;;  %s175_s30 = sshll.u32 %s341_s3, 4  ;;  %s176_s30 = int_to_ptr.hbm [resolvable:$true] %s175_s30 }
  0x10   :  { %189 = vmatmul.msk.f32.vlgmr.msra.gmra.mxu1 %vm63_vm1, %v61_v2  ;;  %191 = vmatmul.msk.f32.vlgmr.msra.gmra.mxu2 %vm63_vm1, %v62_v3  ;;  %s173_s2 = sshll.u32 %s305_s0, 4  ;;  %vm164_vm4 = vcmask 1041408   ;;  %vm166_vm5 = vcmask 256000   ;;  %s174_s2 = int_to_ptr.vmem [resolvable:$true] %s173_s2 }
  0x8c   :  { %v88_v5 = vpop.f32.mrf.mxu0 }
  0x8d   :  { %v91_v6 = vmul.f32 %v88_v5, %v58_v4  ;;  %v120_v7 = vpop.f32.mrf.mxu1 }
  0x8e   :  { %v123_v8 = vmul.f32 %v120_v7, %v58_v4 }
  0x8f   :  { %v93_v9 = vsel %vm92_vm2, %v91_v6, 0.0 }
  0x90   :  { %v94_v10 = vrot.slane %v93_v9, 4  ;;  %v124_v11 = vsel %vm92_vm2, %v123_v8, 0.0 }
  0x91   :  { %v125_v12 = vrot.slane %v124_v11, 4 }
  0x92   :  { %v95_v13 = vadd.f32 %v94_v10, %v93_v9 }
  0x93   :  { %v126_v14 = vadd.f32 %v125_v12, %v124_v11  ;;  %v151_v15 = vpop.f32.mrf.mxu2 }
  0x94   :  { %v96_v16 = vrot.slane %v95_v13, 2  ;;  %v154_v17 = vmul.f32 %v151_v15, %v58_v4 }
  0x95   :  { %v127_v18 = vrot.slane %v126_v14, 2 }
  0x96   :  { %v97_v19 = vadd.f32 %v96_v16, %v95_v13  ;;  %v155_v20 = vsel %vm92_vm2, %v154_v17, 0.0 }
  0x97   :  { %v128_v21 = vadd.f32 %v127_v18, %v126_v14  ;;  %v156_v22 = vrot.slane %v155_v20, 4 }
  0x98   :  { %v98_v24 = vrot.slane %v97_v19, 1 }
  0x99   :  { %v157_v23 = vadd.f32 %v156_v22, %v155_v20  ;;  %v129_v25 = vrot.slane %v128_v21, 1 }
  0x9a   :  { %v99_v28 = vadd.f32 %v98_v24, %v97_v19 }
  0x9b   :  { %v158_v26 = vrot.slane %v157_v23, 2  ;;  %v130_v29 = vadd.f32 %v129_v25, %v128_v21 }
  0x9d   :  { %v159_v27 = vadd.f32 %v158_v26, %v157_v23  ;;  %v163_v32 = vsel %vm162_vm3, %v99_v28, %v130_v29 }
  0x9f   :  { %v160_v30 = vrot.slane %v159_v27, 1 }
  0xa1   :  { %v161_v31 = vadd.f32 %v160_v30, %v159_v27 }
  0xa3   :  { %v165_v33 = vsel %vm164_vm4, %v163_v32, %v161_v31 }
  0xa4   :  { %167 = vst.msk [vmem:[#allocation8] sm:$0x7] %vm166_vm5, %v165_v33 }
  0xa5   :  { %178 = dma.vmem_to_hbm [thread:$0]  %s174_s2, 64, %s176_s30, [#allocation4]  }
  0xa6   :  { %298 = dma.done.wait [#allocation4], 64  }
  0xa7   :  { %299 = vsyncadd [#allocation4], 4294967232 }
  0xa8   :  { %183 = vsyncpa [#allocation3], 1 }
  0xa9   :  { %184 = vsyncpa [#allocation6], 1 }
  0xaa   :  { %185 = vsyncpa [#allocation4], 1 }

</bundles_post_ra>
